<compile_context>
chip_gen: v5e
topology: v5e:2x2
jax: 0.10.0
libtpu: 0.0.40
codegen_flags: <defaults>
</compile_context>

<pallas_src>
import jax
import jax.numpy as jnp
from jax.experimental import pallas as pl
from jax.experimental.pallas import tpu as pltpu


def _make_metric_loss_call(R, bs, C, S, w_dtype):
    inv = 1.0 / float(bs * S)

    def kernel(x_ref, w_ref, out_ref):
        # Fold the 64x logit scale into x (tiny bs*C tensor); cast to the weight
        # dtype so the MXU runs a single-pass bf16 matmul when weights are bf16.
        xv = (x_ref[...] * 64.0).astype(w_dtype)            # (bs, C)

        # Per-class matmuls straight from the native (bs, C, S) layout:
        #   sl[j][i, n] = 64 * <x[i], ref[j, :, n]>   (lane-dense N = S)
        sl = [
            jnp.dot(xv, w_ref[0, j], preferred_element_type=jnp.float32)
            for j in range(bs)
        ]                                                     # bs x (bs, S) f32

        # Numerically stable logsumexp over the class axis j.
        m = sl[0]
        for j in range(1, bs):
            m = jnp.maximum(m, sl[j])
        denom = jnp.zeros_like(m)
        for j in range(bs):
            denom = denom + jnp.exp(sl[j] - m)
        lse = jnp.log(denom) + m                              # (bs, S)

        # correct[i, n] = score[i, i, n]: the class-j slice contributes row i=j.
        # bs masked selects on (bs,S) vregs -- negligible VALU work at these sizes.
        row = jax.lax.broadcasted_iota(jnp.int32, (bs, S), 0)
        correct = jnp.zeros_like(m)
        for j in range(bs):
            correct = correct + jnp.where(row == j, sl[j], 0.0)

        per = lse - correct                                   # (bs, S)
        part = jnp.sum(jnp.sum(per, axis=1, keepdims=True), axis=0, keepdims=True)
        out_ref[...] = jnp.reshape(part * inv, (1, 1, 1))     # per-ref partial loss

    return pl.pallas_call(
        kernel,
        out_shape=jax.ShapeDtypeStruct((R, 1, 1), jnp.float32),
        grid_spec=pltpu.PrefetchScalarGridSpec(
            num_scalar_prefetch=0,
            grid=(R,),
            in_specs=[
                # x: constant full-array block, stays resident in VMEM.
                pl.BlockSpec((bs, C), lambda r: (0, 0)),
                # refs: one ref per grid step, native layout (no wrapper transpose).
                pl.BlockSpec((1, bs, C, S), lambda r: (r, 0, 0, 0)),
            ],
            # Per-ref partial loss; last-two block dims equal full dims (1,1).
            out_specs=pl.BlockSpec((1, 1, 1), lambda r: (r, 0, 0)),
        ),
        compiler_params=pltpu.CompilerParams(
            dimension_semantics=("parallel",),   # independent refs -> megacore-shardable
        ),
    )


def metric_loss(x, refs, *, weights_dtype=jnp.float32):
    """x: (bs, C); refs: list/tuple (or stacked array) of (bs, C, S) arrays.

    weights_dtype=jnp.bfloat16 halves HBM read traffic on the refs stream;
    accumulation and all post-matmul math stay in f32.
    """
    if not isinstance(refs, (list, tuple)):
        refs = [refs[i] for i in range(refs.shape[0])]
    refs = jnp.stack(refs).astype(weights_dtype)   # native (R, bs, C, S) layout
    x = x.astype(jnp.float32)

    R, bs, C, S = refs.shape
    assert x.shape == (bs, C), (x.shape, (bs, C))

    call = _make_metric_loss_call(R, bs, C, S, refs.dtype)
    partials = call(x, refs)                        # (R, 1, 1) per-ref losses
    return jnp.sum(partials)                        # sum over refs


def _reference(x, refs):
    # Pure-JAX mirror of the PyTorch forward, for validation.
    loss = 0.0
    for ref in refs:
        bs, C, S = ref.shape
        ref2 = jnp.transpose(ref, (1, 0, 2)).reshape(C, -1)
        score = (x @ ref2) * 64.0
        score = score.reshape(bs, bs, S).transpose(0, 2, 1).reshape(bs * S, bs)
        labels = jnp.repeat(jnp.arange(bs), S)
        lse = jax.scipy.special.logsumexp(score, axis=1)
        correct = score[jnp.arange(bs * S), labels]
        loss = loss + jnp.mean(lse - correct)
    return loss


if __name__ == "__main__":
    key = jax.random.PRNGKey(0)
    bs, C, S, R = 8, 32, 128, 2
    kx, kr = jax.random.split(key)

    # Typical metric-learning usage: L2-normalized embeddings (scale 64 == cosine logits).
    x = jax.random.normal(kx, (bs, C), dtype=jnp.float32)
    x = x / jnp.linalg.norm(x, axis=-1, keepdims=True)
    refs = jax.random.normal(kr, (R, bs, C, S), dtype=jnp.float32)
    refs = refs / jnp.linalg.norm(refs, axis=2, keepdims=True)
    ref_list = [refs[i] for i in range(R)]

    ref_loss = _reference(x, ref_list)

    # f32 path (default): tight tolerance against the pure-JAX reference.
    loss = jax.block_until_ready(metric_loss(x, ref_list))
    assert loss.shape == ()
    assert bool(jnp.isfinite(loss)), float(loss)
    assert jnp.allclose(loss, ref_loss, atol=1e-3, rtol=1e-3), (
        float(loss), float(ref_loss))

    # bf16 weight path: halved HBM traffic on the refs stream; loose tolerance.
    loss_bf16 = jax.block_until_ready(
        metric_loss(x, ref_list, weights_dtype=jnp.bfloat16))
    assert bool(jnp.isfinite(loss_bf16)), float(loss_bf16)
    assert jnp.allclose(loss_bf16, ref_loss, atol=0.5, rtol=0.1), (
        float(loss_bf16), float(ref_loss))

    print("KERNEL_OK")
</pallas_src>

<mosaic_0001>
module attributes {stable_mosaic.version = 11 : i64} {
  func.func @kernel(%arg0: i32, %arg1: memref<8x32xf32, #tpu.memory_space<vmem>>, %arg2: memref<1x8x32x128xf32, #tpu.memory_space<vmem>>, %arg3: memref<1x1x1xf32, #tpu.memory_space<vmem>>) attributes {dimension_semantics = [#tpu.dimension_semantics<parallel>], iteration_bounds = array<i64: 2>, scalar_prefetch = 0 : i64, scratch_operands = 0 : i64, tpu.core_type = #tpu.core_type<tc>, window_params = [{pipeline_mode = #tpu.pipeline_mode<synchronous>, transform_indices = @transform_0, window_bounds = array<i64: 8, 32>}, {transform_indices = @transform_1, window_bounds = array<i64: 1, 8, 32, 128>}, {transform_indices = @transform_2, window_bounds = array<i64: 1, 1, 1>}]} {
    %c0 = arith.constant 0 : index
    %c0_0 = arith.constant 0 : index
    %0 = vector.load %arg1[%c0, %c0_0] : memref<8x32xf32, #tpu.memory_space<vmem>>, vector<8x32xf32>
    %cst = arith.constant 6.400000e+01 : f32
    %1 = vector.broadcast %cst : f32 to vector<8x32xf32>
    %2 = arith.mulf %0, %1 : vector<8x32xf32>
    %c0_1 = arith.constant 0 : index
    %c0_2 = arith.constant 0 : index
    %c0_3 = arith.constant 0 : index
    %c0_4 = arith.constant 0 : index
    %3 = vector.load %arg2[%c0_1, %c0_2, %c0_3, %c0_4] : memref<1x8x32x128xf32, #tpu.memory_space<vmem>>, vector<1x1x32x128xf32>
    %4 = vector.shape_cast %3 : vector<1x1x32x128xf32> to vector<32x128xf32>
    %cst_5 = arith.constant dense<0.000000e+00> : vector<8x128xf32>
    %5 = tpu.matmul %2, %4, %cst_5 {dimension_numbers = #tpu.dot_dimension_numbers<[1], [0], [0], [1], [0, 0, 1, 1], [], []>} : vector<8x32xf32>, vector<32x128xf32>, vector<8x128xf32> -> vector<8x128xf32>
    %c0_6 = arith.constant 0 : index
    %c1 = arith.constant 1 : index
    %c0_7 = arith.constant 0 : index
    %c0_8 = arith.constant 0 : index
    %6 = vector.load %arg2[%c0_6, %c1, %c0_7, %c0_8] : memref<1x8x32x128xf32, #tpu.memory_space<vmem>>, vector<1x1x32x128xf32>
    %7 = vector.shape_cast %6 : vector<1x1x32x128xf32> to vector<32x128xf32>
    %cst_9 = arith.constant dense<0.000000e+00> : vector<8x128xf32>
    %8 = tpu.matmul %2, %7, %cst_9 {dimension_numbers = #tpu.dot_dimension_numbers<[1], [0], [0], [1], [0, 0, 1, 1], [], []>} : vector<8x32xf32>, vector<32x128xf32>, vector<8x128xf32> -> vector<8x128xf32>
    %c0_10 = arith.constant 0 : index
    %c2 = arith.constant 2 : index
    %c0_11 = arith.constant 0 : index
    %c0_12 = arith.constant 0 : index
    %9 = vector.load %arg2[%c0_10, %c2, %c0_11, %c0_12] : memref<1x8x32x128xf32, #tpu.memory_space<vmem>>, vector<1x1x32x128xf32>
    %10 = vector.shape_cast %9 : vector<1x1x32x128xf32> to vector<32x128xf32>
    %cst_13 = arith.constant dense<0.000000e+00> : vector<8x128xf32>
    %11 = tpu.matmul %2, %10, %cst_13 {dimension_numbers = #tpu.dot_dimension_numbers<[1], [0], [0], [1], [0, 0, 1, 1], [], []>} : vector<8x32xf32>, vector<32x128xf32>, vector<8x128xf32> -> vector<8x128xf32>
    %c0_14 = arith.constant 0 : index
    %c3 = arith.constant 3 : index
    %c0_15 = arith.constant 0 : index
    %c0_16 = arith.constant 0 : index
    %12 = vector.load %arg2[%c0_14, %c3, %c0_15, %c0_16] : memref<1x8x32x128xf32, #tpu.memory_space<vmem>>, vector<1x1x32x128xf32>
    %13 = vector.shape_cast %12 : vector<1x1x32x128xf32> to vector<32x128xf32>
    %cst_17 = arith.constant dense<0.000000e+00> : vector<8x128xf32>
    %14 = tpu.matmul %2, %13, %cst_17 {dimension_numbers = #tpu.dot_dimension_numbers<[1], [0], [0], [1], [0, 0, 1, 1], [], []>} : vector<8x32xf32>, vector<32x128xf32>, vector<8x128xf32> -> vector<8x128xf32>
    %c0_18 = arith.constant 0 : index
    %c4 = arith.constant 4 : index
    %c0_19 = arith.constant 0 : index
    %c0_20 = arith.constant 0 : index
    %15 = vector.load %arg2[%c0_18, %c4, %c0_19, %c0_20] : memref<1x8x32x128xf32, #tpu.memory_space<vmem>>, vector<1x1x32x128xf32>
    %16 = vector.shape_cast %15 : vector<1x1x32x128xf32> to vector<32x128xf32>
    %cst_21 = arith.constant dense<0.000000e+00> : vector<8x128xf32>
    %17 = tpu.matmul %2, %16, %cst_21 {dimension_numbers = #tpu.dot_dimension_numbers<[1], [0], [0], [1], [0, 0, 1, 1], [], []>} : vector<8x32xf32>, vector<32x128xf32>, vector<8x128xf32> -> vector<8x128xf32>
    %c0_22 = arith.constant 0 : index
    %c5 = arith.constant 5 : index
    %c0_23 = arith.constant 0 : index
    %c0_24 = arith.constant 0 : index
    %18 = vector.load %arg2[%c0_22, %c5, %c0_23, %c0_24] : memref<1x8x32x128xf32, #tpu.memory_space<vmem>>, vector<1x1x32x128xf32>
    %19 = vector.shape_cast %18 : vector<1x1x32x128xf32> to vector<32x128xf32>
    %cst_25 = arith.constant dense<0.000000e+00> : vector<8x128xf32>
    %20 = tpu.matmul %2, %19, %cst_25 {dimension_numbers = #tpu.dot_dimension_numbers<[1], [0], [0], [1], [0, 0, 1, 1], [], []>} : vector<8x32xf32>, vector<32x128xf32>, vector<8x128xf32> -> vector<8x128xf32>
    %c0_26 = arith.constant 0 : index
    %c6 = arith.constant 6 : index
    %c0_27 = arith.constant 0 : index
    %c0_28 = arith.constant 0 : index
    %21 = vector.load %arg2[%c0_26, %c6, %c0_27, %c0_28] : memref<1x8x32x128xf32, #tpu.memory_space<vmem>>, vector<1x1x32x128xf32>
    %22 = vector.shape_cast %21 : vector<1x1x32x128xf32> to vector<32x128xf32>
    %cst_29 = arith.constant dense<0.000000e+00> : vector<8x128xf32>
    %23 = tpu.matmul %2, %22, %cst_29 {dimension_numbers = #tpu.dot_dimension_numbers<[1], [0], [0], [1], [0, 0, 1, 1], [], []>} : vector<8x32xf32>, vector<32x128xf32>, vector<8x128xf32> -> vector<8x128xf32>
    %c0_30 = arith.constant 0 : index
    %c7 = arith.constant 7 : index
    %c0_31 = arith.constant 0 : index
    %c0_32 = arith.constant 0 : index
    %24 = vector.load %arg2[%c0_30, %c7, %c0_31, %c0_32] : memref<1x8x32x128xf32, #tpu.memory_space<vmem>>, vector<1x1x32x128xf32>
    %25 = vector.shape_cast %24 : vector<1x1x32x128xf32> to vector<32x128xf32>
    %cst_33 = arith.constant dense<0.000000e+00> : vector<8x128xf32>
    %26 = tpu.matmul %2, %25, %cst_33 {dimension_numbers = #tpu.dot_dimension_numbers<[1], [0], [0], [1], [0, 0, 1, 1], [], []>} : vector<8x32xf32>, vector<32x128xf32>, vector<8x128xf32> -> vector<8x128xf32>
    %27 = arith.maximumf %5, %8 : vector<8x128xf32>
    %28 = arith.maximumf %27, %11 : vector<8x128xf32>
    %29 = arith.maximumf %28, %14 : vector<8x128xf32>
    %30 = arith.maximumf %29, %17 : vector<8x128xf32>
    %31 = arith.maximumf %30, %20 : vector<8x128xf32>
    %32 = arith.maximumf %31, %23 : vector<8x128xf32>
    %33 = arith.maximumf %32, %26 : vector<8x128xf32>
    %cst_34 = arith.constant 0.000000e+00 : f32
    %34 = vector.broadcast %cst_34 : f32 to vector<8x128xf32>
    %35 = arith.subf %5, %33 : vector<8x128xf32>
    %36 = math.exp %35 : vector<8x128xf32>
    %37 = arith.addf %34, %36 : vector<8x128xf32>
    %38 = arith.subf %8, %33 : vector<8x128xf32>
    %39 = math.exp %38 : vector<8x128xf32>
    %40 = arith.addf %37, %39 : vector<8x128xf32>
    %41 = arith.subf %11, %33 : vector<8x128xf32>
    %42 = math.exp %41 : vector<8x128xf32>
    %43 = arith.addf %40, %42 : vector<8x128xf32>
    %44 = arith.subf %14, %33 : vector<8x128xf32>
    %45 = math.exp %44 : vector<8x128xf32>
    %46 = arith.addf %43, %45 : vector<8x128xf32>
    %47 = arith.subf %17, %33 : vector<8x128xf32>
    %48 = math.exp %47 : vector<8x128xf32>
    %49 = arith.addf %46, %48 : vector<8x128xf32>
    %50 = arith.subf %20, %33 : vector<8x128xf32>
    %51 = math.exp %50 : vector<8x128xf32>
    %52 = arith.addf %49, %51 : vector<8x128xf32>
    %53 = arith.subf %23, %33 : vector<8x128xf32>
    %54 = math.exp %53 : vector<8x128xf32>
    %55 = arith.addf %52, %54 : vector<8x128xf32>
    %56 = arith.subf %26, %33 : vector<8x128xf32>
    %57 = math.exp %56 : vector<8x128xf32>
    %58 = arith.addf %55, %57 : vector<8x128xf32>
    %59 = math.log %58 : vector<8x128xf32>
    %60 = arith.addf %59, %33 : vector<8x128xf32>
    %61 = tpu.iota {dimensions = array<i32: 0>} : vector<8x128xi32>
    %cst_35 = arith.constant 0.000000e+00 : f32
    %62 = vector.broadcast %cst_35 : f32 to vector<8x128xf32>
    %c0_i32 = arith.constant 0 : i32
    %63 = vector.broadcast %c0_i32 : i32 to vector<8x128xi32>
    %64 = arith.cmpi eq, %61, %63 : vector<8x128xi32>
    %cst_36 = arith.constant 0.000000e+00 : f32
    %65 = vector.broadcast %cst_36 : f32 to vector<8x128xf32>
    %66 = arith.select %64, %5, %65 : vector<8x128xi1>, vector<8x128xf32>
    %67 = arith.addf %62, %66 : vector<8x128xf32>
    %c1_i32 = arith.constant 1 : i32
    %68 = vector.broadcast %c1_i32 : i32 to vector<8x128xi32>
    %69 = arith.cmpi eq, %61, %68 : vector<8x128xi32>
    %cst_37 = arith.constant 0.000000e+00 : f32
    %70 = vector.broadcast %cst_37 : f32 to vector<8x128xf32>
    %71 = arith.select %69, %8, %70 : vector<8x128xi1>, vector<8x128xf32>
    %72 = arith.addf %67, %71 : vector<8x128xf32>
    %c2_i32 = arith.constant 2 : i32
    %73 = vector.broadcast %c2_i32 : i32 to vector<8x128xi32>
    %74 = arith.cmpi eq, %61, %73 : vector<8x128xi32>
    %cst_38 = arith.constant 0.000000e+00 : f32
    %75 = vector.broadcast %cst_38 : f32 to vector<8x128xf32>
    %76 = arith.select %74, %11, %75 : vector<8x128xi1>, vector<8x128xf32>
    %77 = arith.addf %72, %76 : vector<8x128xf32>
    %c3_i32 = arith.constant 3 : i32
    %78 = vector.broadcast %c3_i32 : i32 to vector<8x128xi32>
    %79 = arith.cmpi eq, %61, %78 : vector<8x128xi32>
    %cst_39 = arith.constant 0.000000e+00 : f32
    %80 = vector.broadcast %cst_39 : f32 to vector<8x128xf32>
    %81 = arith.select %79, %14, %80 : vector<8x128xi1>, vector<8x128xf32>
    %82 = arith.addf %77, %81 : vector<8x128xf32>
    %c4_i32 = arith.constant 4 : i32
    %83 = vector.broadcast %c4_i32 : i32 to vector<8x128xi32>
    %84 = arith.cmpi eq, %61, %83 : vector<8x128xi32>
    %cst_40 = arith.constant 0.000000e+00 : f32
    %85 = vector.broadcast %cst_40 : f32 to vector<8x128xf32>
    %86 = arith.select %84, %17, %85 : vector<8x128xi1>, vector<8x128xf32>
    %87 = arith.addf %82, %86 : vector<8x128xf32>
    %c5_i32 = arith.constant 5 : i32
    %88 = vector.broadcast %c5_i32 : i32 to vector<8x128xi32>
    %89 = arith.cmpi eq, %61, %88 : vector<8x128xi32>
    %cst_41 = arith.constant 0.000000e+00 : f32
    %90 = vector.broadcast %cst_41 : f32 to vector<8x128xf32>
    %91 = arith.select %89, %20, %90 : vector<8x128xi1>, vector<8x128xf32>
    %92 = arith.addf %87, %91 : vector<8x128xf32>
    %c6_i32 = arith.constant 6 : i32
    %93 = vector.broadcast %c6_i32 : i32 to vector<8x128xi32>
    %94 = arith.cmpi eq, %61, %93 : vector<8x128xi32>
    %cst_42 = arith.constant 0.000000e+00 : f32
    %95 = vector.broadcast %cst_42 : f32 to vector<8x128xf32>
    %96 = arith.select %94, %23, %95 : vector<8x128xi1>, vector<8x128xf32>
    %97 = arith.addf %92, %96 : vector<8x128xf32>
    %c7_i32 = arith.constant 7 : i32
    %98 = vector.broadcast %c7_i32 : i32 to vector<8x128xi32>
    %99 = arith.cmpi eq, %61, %98 : vector<8x128xi32>
    %cst_43 = arith.constant 0.000000e+00 : f32
    %100 = vector.broadcast %cst_43 : f32 to vector<8x128xf32>
    %101 = arith.select %99, %26, %100 : vector<8x128xi1>, vector<8x128xf32>
    %102 = arith.addf %97, %101 : vector<8x128xf32>
    %103 = arith.subf %60, %102 : vector<8x128xf32>
    %cst_44 = arith.constant dense<0.000000e+00> : vector<8xf32>
    %104 = vector.multi_reduction <add>, %103, %cst_44 [1] : vector<8x128xf32> to vector<8xf32>
    %105 = vector.shape_cast %104 : vector<8xf32> to vector<8x1xf32>
    %cst_45 = arith.constant dense<0.000000e+00> : vector<1xf32>
    %106 = vector.multi_reduction <add>, %105, %cst_45 [0] : vector<8x1xf32> to vector<1xf32>
    %107 = vector.shape_cast %106 : vector<1xf32> to vector<1x1xf32>
    %cst_46 = arith.constant 9.765625E-4 : f32
    %108 = vector.broadcast %cst_46 : f32 to vector<1x1xf32>
    %109 = arith.mulf %107, %108 : vector<1x1xf32>
    %110 = vector.shape_cast %109 : vector<1x1xf32> to vector<1x1x1xf32>
    %c0_47 = arith.constant 0 : index
    %c0_48 = arith.constant 0 : index
    %c0_49 = arith.constant 0 : index
    %111 = vector.load %arg3[%c0_47, %c0_48, %c0_49] : memref<1x1x1xf32, #tpu.memory_space<vmem>>, vector<1x1x1xf32>
    tpu.vector_store %arg3[%c0_47, %c0_48, %c0_49], %110 {strides = array<i32>} : memref<1x1x1xf32, #tpu.memory_space<vmem>>, vector<1x1x1xf32>,
    return
  }
  func.func @transform_0(%arg0: i32) -> (i32, i32) {
    %c0_i32 = arith.constant 0 : i32
    %c0_i32_0 = arith.constant 0 : i32
    %c0_i32_1 = arith.constant 0 : i32
    return %c0_i32, %c0_i32_0 : i32, i32
  }
  func.func @transform_1(%arg0: i32) -> (i32, i32, i32, i32) {
    %c0_i32 = arith.constant 0 : i32
    %c0_i32_0 = arith.constant 0 : i32
    %c0_i32_1 = arith.constant 0 : i32
    %c0_i32_2 = arith.constant 0 : i32
    return %arg0, %c0_i32, %c0_i32_0, %c0_i32_1 : i32, i32, i32, i32
  }
  func.func @transform_2(%arg0: i32) -> (i32, i32, i32) {
    %c0_i32 = arith.constant 0 : i32
    %c0_i32_0 = arith.constant 0 : i32
    %c0_i32_1 = arith.constant 0 : i32
    return %arg0, %c0_i32, %c0_i32_0 : i32, i32, i32
  }
}

</mosaic_0001>

<bundles_post_ra>
// kernel: tpu_custom_call.1
= control target key start
LH: loop header
LB: loop body
LE: loop exit
PB: predicated region body
PF: predicated region fallthrough
CT: control target
= control target key end

     0   :  { %7 = vsyncpa [#allocation3], 0  ;;  %s942_s0 = inlined_call_operand.hbm [shape: f32[8,32], index: 0, kind: input, shape index: {}]   ;;  %s943_s1 = inlined_call_operand.hbm [shape: f32[2,8,32,128], index: 1, kind: input, shape index: {}]   ;;  %s944_s2 = inlined_call_operand.vmem [shape: f32[2,1,1], index: 2, kind: output, shape index: {}]  }
   0x1   :  { %8 = vsyncpa [#allocation5], 0 }
   0x2   :  { %10 = vsyncpa [#allocation5 + $0x1], 0  ;;  %s770_s9 = smov 0   ;;  %s772_s10 = smov 0  }
   0x3   :  { %s774_s11 = smov 0   ;;  %s776_s12 = smov 0  }
   0x4 LB: > { %s789_s13 = sadd.s32 4294967295, %s750_s12   ;;  %s792_s14 = sadd.s32 1, %s750_s12   ;;  %s750_s12 = sphi %s776_s12, %s952_s12   ;;  %s746_s11 = sphi %s774_s11, %s951_s11   ;;  %s742_s10 = sphi %s772_s10, %s950_s10   ;;  %s738_s9 = sphi %s770_s9, %s949_s9  }
   0x5   : > { %s41_s15 = ssub.s32 %s750_s12, %s792_s14  ;;  %s44_s16 = sadd.s32 1, %s746_s11 }
   0x6   : > { %p42_p0 = scmp.eq.s32.totalorder %s41_s15, 0  ;;  %p51_p1 = scmp.ne.s32.totalorder %s746_s11, %s742_s10 }
   0x7   : > { %p52_p2 = scmp.eq.s32.totalorder %s750_s12, 0  ;;  %p57_p3 = scmp.ne.s32.totalorder %s742_s10, %s738_s9 }
   0x8   : > { %s802_s17 = scalar_select %p42_p0, %s746_s11, %s44_s16  }
   0x9   : > { %p804_p4 = por %p52_p2, %p51_p1  ;;  %p58_p5 = scmp.eq.s32.totalorder %s789_s13, 0 }
   0xa   : > { %p534_p6 = scmp.ge.s32.totalorder %s750_s12, 1  ;;  %p94_p7 = scmp.lt.s32.totalorder %s750_s12, 3 }
   0xb   : > { %p813_p8 = por %p58_p5, %p57_p3  ;;  %s106_s23 = sshll.u32 %s942_s0, 4  ;;  %s107_s23 = int_to_ptr.hbm [resolvable:$true] %s106_s23 }
   0xc   : > { %p817_p9 = pnand %p534_p6, %p94_p7  ;;  %s752_s24 = smov [#allocation2]  }
   0xd   : > { %s108_s25 = sshll.u32 %s752_s24, 4  ;;  %p597_p12 = scmp.lt.s32.totalorder %s750_s12, 2  ;;  %s109_s25 = int_to_ptr.vmem [resolvable:$true] %s108_s25 }
   0xe   : > { %p588_p10 = pneg %p817_p9  ;;  %s119_s26 = sand.u32 1, %s746_s11  }
   0xf   : > { %s581_s27 = sshll.u32 %s750_s12, 8  ;;  %p833_p13 = pnand %p597_p12, %p804_p4 }
  0x10   : > { %p589_p11 = pnand %p588_p10, %p58_p5  ;;  %s537_s29 = sshll.u32 %s119_s26, 8 }
  0x11   : > { %s128_s4 = scalar_lea.hbm %s943_s1, %s581_s27  ;;  %s123_s6 = scalar_lea.vmem [#allocation4], %s537_s29 }
  0x12   : > { %591 = dma.hbm_to_vmem [thread:$0]  (!%p589_p11), %s107_s23, 128, %s109_s25, [#allocation3]  }
  0x13   : > { %s129_s5 = sshll.u32 %s128_s4, 4  ;;  %s131_s7 = sshll.u32 %s123_s6, 4  ;;  %s130_s5 = int_to_ptr.hbm [resolvable:$true] %s129_s5  ;;  %s132_s7 = int_to_ptr.vmem [resolvable:$true] %s131_s7 }
  0x14   : > { %s120_s8 = scalar_lea.sflag [#allocation5], %s119_s26  ;;  %s682_s9 = sshra.s32 %s130_s5, 4  ;;  %s683_s9 = int_to_ptr.hbm [resolvable:$true] %s682_s9 }
  0x15   : > { %s684_s12 = scalar_lea.hbm %s683_s9, 256  ;;  %p686_p1 = pneg %p833_p13 }
  0x16   : > { %p685_p0 = scmp.ne.s32.totalorder %s683_s9, %s684_s12  ;;  %s689_s18 = scalar_lea.hbm %s943_s1, 512 }
  0x17   : > { %p690_p4 = scmp.lt.s32.totalorder %s683_s9, %s943_s1  ;;  %p691_p6 = scmp.lt.s32.totalorder %s689_s18, %s684_s12 }
  0x18   : > { %p687_p2 = pnand %p686_p1, %p685_p0 }
  0x19   : > { %p692_p7 = por %p691_p6, %p690_p4 }
  0x1a   : > { %p688_p3 = pneg %p687_p2 }
  0x1c   : > { %p693_p10 = pnand %p692_p7, %p688_p3 }
  0x1e   : > { %696 = shalt.err (!%p693_p10)
}
  0x1f   : > { %s753_s23 = smov 128   ;;  %s754_s24 = smov 8  }
  0x20   : > { %595 = dma.hbm_to_vmem [thread:$0]  (!%p833_p13), %s130_s5, 4096, %s132_s7, %s120_s8, %s753_s23, %s753_s23, %s754_s24  }
  0x21   : > { %143 = sbr.rel (%p817_p9) target bundleno = 368 (0x170), region = 28 }
  0x26   : > { %729 = dma.done.wait (%p58_p5), [#allocation3], 128  }
  0x27   : > { %731 = vsyncadd (%p58_p5), [#allocation3], 4294967168  ;;  %s150_s25 = sand.u32 1, %s742_s10  }
  0x28   : > { %s542_s26 = sshll.u32 %s150_s25, 8  ;;  %s151_s27 = scalar_lea.sflag [#allocation5], %s150_s25 }
  0x29   : > { %s857_s29 = scalar_lea.vmem [#allocation4], %s542_s26 }
  0x2a   : > { %733 = dma.done.wait (%p813_p8), %s151_s27, 4096  }
  0x2b   : > { %735 = vsyncadd (%p813_p8), %s151_s27, 4294963200  ;;  %v552_v0 = vld [vmem:[%s857_s29 + $0x58] sm:$0xff]  ;;  %v551_v3 = vld [vmem:[%s857_s29 + $0x50] sm:$0xff]  ;;  %vm183_vm0 = vcmask 261120   ;;  %v424_v49 = vlaneseq  ;;  %p174_p5 = scmp.lt.s32.totalorder %s789_s13, 1  ;;  %vm460_vm9 = vcmask 0  }
  0x2c   : > { %v182_v1 = vld [vmem:[%s857_s29 + $0x18] sm:$0xff]  ;;  %249 = vmatpush.msra.mxu2 %v552_v0  ;;  %v181_v5 = vld [vmem:[%s857_s29 + $0x10] sm:$0xff]  ;;  %v550_v7 = vld [vmem:[%s857_s29 + $0x48] sm:$0xff] }
  0x2d   : > { %v547_v2 = vld [vmem:[%s857_s29 + $0x38] sm:$0xff]  ;;  %199 = vmatpush.msra.mxu0 %v182_v1  ;;  %v546_v6 = vld [vmem:[%s857_s29 + $0x30] sm:$0xff]  ;;  %v180_v9 = vld [vmem:[%s857_s29 + $0x8] sm:$0xff]  ;;  %v425_v56 = vshrl.u32 %v424_v49, 7  ;;  %s954_s13 = smov (!%p174_p5, %s789_s13), 1 }
  0x2e   : > { %v557_v4 = vld [vmem:[%s857_s29 + $0x78] sm:$0xff]  ;;  %224 = vmatpush.msra.mxu1 %v547_v2  ;;  %v556_v8 = vld [vmem:[%s857_s29 + $0x70] sm:$0xff]  ;;  %250 = vmatpush.msra.mxu2 %v551_v3  ;;  %v545_v10 = vld [vmem:[%s857_s29 + $0x28] sm:$0xff]  ;;  %s176_s28 = scalar_lea.vmem %s944_s2, %s954_s13 }
  0x2f   : > { %274 = vmatpush.msra.mxu3 %v557_v4  ;;  %200 = vmatpush.msra.mxu0 %v181_v5  ;;  %v549_v11 = vld [vmem:[%s857_s29 + $0x40] sm:$0xff]  ;;  %v555_v12 = vld [vmem:[%s857_s29 + $0x68] sm:$0xff]  ;;  %v177_v13 = vld [vmem:[#allocation2] sm:$0xff]  ;;  %vm426_vm1 = vcmp.eq.s32.totalorder %v425_v56, 0  ;;  %vm429_vm2 = vcmp.eq.s32.totalorder %v425_v56, 1  ;;  %vm432_vm3 = vcmp.eq.s32.totalorder %v425_v56, 2 }
  0x30   : > { %225 = vmatpush.msra.mxu1 %v546_v6  ;;  %251 = vmatpush.msra.mxu2 %v550_v7  ;;  %v178_v14 = vmul.f32 64.0, %v177_v13  ;;  %v179_v15 = vld [vmem:[%s857_s29] sm:$0xff]  ;;  %v572_v17 = vld [vmem:[%s857_s29 + $0xd8] sm:$0xff]  ;;  %v571_v20 = vld [vmem:[%s857_s29 + $0xd0] sm:$0xff]  ;;  %vm435_vm4 = vcmp.eq.s32.totalorder %v425_v56, 3  ;;  %vm438_vm5 = vcmp.eq.s32.totalorder %v425_v56, 4 }
  0x31   : > { %275 = vmatpush.msra.mxu3 %v556_v8  ;;  %201 = vmatpush.msra.mxu0 %v180_v9  ;;  %v544_v16 = vld [vmem:[%s857_s29 + $0x20] sm:$0xff]  ;;  %v562_v19 = vld [vmem:[%s857_s29 + $0x98] sm:$0xff]  ;;  %v561_v22 = vld [vmem:[%s857_s29 + $0x90] sm:$0xff]  ;;  %vm441_vm6 = vcmp.eq.s32.totalorder %v425_v56, 5  ;;  %vm444_vm7 = vcmp.eq.s32.totalorder %v425_v56, 6  ;;  %vm447_vm8 = vcmp.eq.s32.totalorder %v425_v56, 7 }
  0x32   : > { %226 = vmatpush.msra.mxu1 %v545_v10  ;;  %v554_v18 = vld [vmem:[%s857_s29 + $0x60] sm:$0xff]  ;;  %252 = vmatpush.msra.mxu2 %v549_v11  ;;  %v577_v21 = vld [vmem:[%s857_s29 + $0xf8] sm:$0xff]  ;;  %v570_v24 = vld [vmem:[%s857_s29 + $0xc8] sm:$0xff] }
  0x33   : > { %276 = vmatpush.msra.mxu3 %v555_v12  ;;  %202 = vmatpush.msra.mxu0 %v179_v15  ;;  %v567_v23 = vld [vmem:[%s857_s29 + $0xb8] sm:$0xff]  ;;  %v576_v25 = vld [vmem:[%s857_s29 + $0xf0] sm:$0xff]  ;;  %v560_v26 = vld [vmem:[%s857_s29 + $0x88] sm:$0xff] }
  0x34   : > { %553 = vmatmul.msk.f32.vlgmr.msra.gmra.mxu2 %vm183_vm0, %v178_v14  ;;  %227 = vmatpush.msra.mxu1 %v544_v16  ;;  %v566_v27 = vld [vmem:[%s857_s29 + $0xb0] sm:$0xff]  ;;  %v569_v28 = vld [vmem:[%s857_s29 + $0xc0] sm:$0xff]  ;;  %v575_v29 = vld [vmem:[%s857_s29 + $0xe8] sm:$0xff] }
  0x35   : > { %349 = vmatpush.msrb.mxu2 %v572_v17  ;;  %277 = vmatpush.msra.mxu3 %v554_v18  ;;  %v559_v30 = vld [vmem:[%s857_s29 + $0x80] sm:$0xff]  ;;  %v565_v31 = vld [vmem:[%s857_s29 + $0xa8] sm:$0xff] }
  0x36   : > { %543 = vmatmul.msk.f32.vlgmr.msra.gmra.mxu0 %vm183_vm0, %v178_v14  ;;  %548 = vmatmul.msk.f32.vlgmr.msra.gmra.mxu1 %vm183_vm0, %v178_v14  ;;  %v574_v32 = vld [vmem:[%s857_s29 + $0xe0] sm:$0xff] }
  0x37   : > { %558 = vmatmul.msk.f32.vlgmr.msra.gmra.mxu3 %vm183_vm0, %v178_v14  ;;  %299 = vmatpush.msrb.mxu0 %v562_v19  ;;  %v564_v33 = vld [vmem:[%s857_s29 + $0xa0] sm:$0xff] }
  0x38   : > { %350 = vmatpush.msrb.mxu2 %v571_v20  ;;  %374 = vmatpush.msrb.mxu3 %v577_v21 }
  0x39   : > { %300 = vmatpush.msrb.mxu0 %v561_v22  ;;  %324 = vmatpush.msrb.mxu1 %v567_v23 }
  0x3a   : > { %351 = vmatpush.msrb.mxu2 %v570_v24  ;;  %375 = vmatpush.msrb.mxu3 %v576_v25 }
  0x3b   : > { %301 = vmatpush.msrb.mxu0 %v560_v26  ;;  %325 = vmatpush.msrb.mxu1 %v566_v27 }
  0x3c   : > { %352 = vmatpush.msrb.mxu2 %v569_v28  ;;  %376 = vmatpush.msrb.mxu3 %v575_v29 }
  0x3d   : > { %302 = vmatpush.msrb.mxu0 %v559_v30  ;;  %326 = vmatpush.msrb.mxu1 %v565_v31 }
  0x3e   : > { %573 = vmatmul.msk.f32.vlgmr.msrb.gmra.mxu2 %vm183_vm0, %v178_v14  ;;  %377 = vmatpush.msrb.mxu3 %v574_v32 }
  0x3f   : > { %563 = vmatmul.msk.f32.vlgmr.msrb.gmra.mxu0 %vm183_vm0, %v178_v14  ;;  %327 = vmatpush.msrb.mxu1 %v564_v33 }
  0x40   : > { %578 = vmatmul.msk.f32.vlgmr.msrb.gmra.mxu3 %vm183_vm0, %v178_v14  ;;  %568 = vmatmul.msk.f32.vlgmr.msrb.gmra.mxu1 %vm183_vm0, %v178_v14 }
  0xb3   : > { %v204_v34 = vpop.f32.mrf.mxu0  ;;  %v229_v35 = vpop.f32.mrf.mxu1 }
  0xb4   : > { %v382_v36 = vmax.f32 %v204_v34, %v229_v35  ;;  %v427_v2 = vsel %vm426_vm1, %v204_v34, 0.0  ;;  %v430_v3 = vsel %vm429_vm2, %v229_v35, 0.0 }
  0xb5   : > { %v431_v9 = vadd.f32 %v430_v3, %v427_v2 }
  0xb7   : > { %v254_v37 = vpop.f32.mrf.mxu2 }
  0xb8   : > { %v383_v38 = vmax.f32 %v382_v36, %v254_v37  ;;  %v433_v6 = vsel %vm432_vm3, %v254_v37, 0.0 }
  0xb9   : > { %v434_v13 = vadd.f32 %v433_v6, %v431_v9 }
  0xba   : > { %v279_v39 = vpop.f32.mrf.mxu3 }
  0xbb   : > { %v384_v40 = vmax.f32 %v383_v38, %v279_v39  ;;  %v436_v14 = vsel %vm435_vm4, %v279_v39, 0.0 }
  0xbc   : > { %v304_v41 = vpop.f32.mrf.mxu0  ;;  %v437_v19 = vadd.f32 %v436_v14, %v434_v13 }
  0xbd   : > { %v385_v42 = vmax.f32 %v384_v40, %v304_v41  ;;  %v329_v43 = vpop.f32.mrf.mxu1  ;;  %v439_v20 = vsel %vm438_vm5, %v304_v41, 0.0 }
  0xbe   : > { %v440_v25 = vadd.f32 %v439_v20, %v437_v19  ;;  %v442_v26 = vsel %vm441_vm6, %v329_v43, 0.0 }
  0xbf   : > { %v386_v44 = vmax.f32 %v385_v42, %v329_v43 }
  0xc0   : > { %v443_v28 = vadd.f32 %v442_v26, %v440_v25 }
  0xc1   : > { %v903_v45 = vpop.f32.mrf.mxu2 }
  0xc2   : > { %v387_v46 = vmax.f32 %v386_v44, %v903_v45  ;;  %v445_v29 = vsel %vm444_vm7, %v903_v45, 0.0 }
  0xc3   : > { %v906_v47 = vpop.f32.mrf.mxu3  ;;  %v446_v30 = vadd.f32 %v445_v29, %v443_v28 }
  0xc4   : > { %v909_v48 = vmax.f32 %v387_v46, %v906_v47  ;;  %v448_v32 = vsel %vm447_vm8, %v906_v47, 0.0 }
  0xc6   : > { %v389_v50 = vsub.f32 %v204_v34, %v909_v48  ;;  %v393_v51 = vsub.f32 %v229_v35, %v909_v48  ;;  %v397_v52 = vsub.f32 %v254_v37, %v909_v48  ;;  %v401_v55 = vsub.f32 %v279_v39, %v909_v48 }
  0xc7   : > { %v405_v58 = vsub.f32 %v304_v41, %v909_v48  ;;  %v409_v60 = vsub.f32 %v329_v43, %v909_v48  ;;  %v413_v62 = vsub.f32 %v903_v45, %v909_v48  ;;  %v417_v63 = vsub.f32 %v906_v47, %v909_v48 }
  0xc8   : > { %v390_v53 = vmul.f32 1.442695, %v389_v50  ;;  %v394_v54 = vmul.f32 1.442695, %v393_v51  ;;  %v398_v57 = vmul.f32 1.442695, %v397_v52  ;;  %v449_v35 = vadd.f32 %v448_v32, %v446_v30 }
  0xc9   : > { %v402_v59 = vmul.f32 1.442695, %v401_v55  ;;  %v406_v61 = vmul.f32 1.442695, %v405_v58  ;;  %v410_v0 = vmul.f32 1.442695, %v409_v60 }
  0xca   : > { %634 = vpow2.f32 %v390_v53  ;;  %v414_v5 = vmul.f32 1.442695, %v413_v62  ;;  %v418_v10 = vmul.f32 1.442695, %v417_v63 }
  0xcb   : > { %636 = vpow2.f32 %v394_v54 }
  0xcc   : > { %638 = vpow2.f32 %v398_v57 }
  0xcd   : > { %640 = vpow2.f32 %v402_v59 }
  0xce   : > { %642 = vpow2.f32 %v406_v61 }
  0xcf   : > { %644 = vpow2.f32 %v410_v0 }
  0xd0   : > { %v635_v1 = vpop.eup %634  ;;  %646 = vpow2.f32 %v414_v5 }
  0xd1   : > { %v637_v4 = vpop.eup %636  ;;  %648 = vpow2.f32 %v418_v10 }
  0xd2   : > { %v396_v7 = vadd.f32 %v637_v4, %v635_v1  ;;  %v639_v8 = vpop.eup %638 }
  0xd3   : > { %v641_v12 = vpop.eup %640 }
  0xd4   : > { %v400_v11 = vadd.f32 %v639_v8, %v396_v7  ;;  %v643_v16 = vpop.eup %642 }
  0xd5   : > { %v645_v18 = vpop.eup %644 }
  0xd6   : > { %v404_v15 = vadd.f32 %v641_v12, %v400_v11  ;;  %v647_v22 = vpop.eup %646 }
  0xd7   : > { %v649_v24 = vpop.eup %648 }
  0xd8   : > { %v408_v17 = vadd.f32 %v643_v16, %v404_v15 }
  0xda   : > { %v412_v21 = vadd.f32 %v645_v18, %v408_v17 }
  0xdc   : > { %v416_v23 = vadd.f32 %v647_v22, %v412_v21 }
  0xde   : > { %v420_v27 = vadd.f32 %v649_v24, %v416_v23 }
  0xe0   : > { %650 = vlog2.f32 %v420_v27 }
  0xe6   : > { %v651_v31 = vpop.eup %650 }
  0xe7   : > { %v422_v33 = vmul.f32 0.6931472, %v651_v31 }
  0xe9   : > { %v423_v34 = vadd.f32 %v422_v33, %v909_v48 }
  0xeb   : > { %v450_v36 = vsub.f32 %v423_v34, %v449_v35 }
  0xed   : > { %451 = vadd.xlane.f32.xlu0 %v450_v36 }
 0x160   : > { %v452_v37 = vpop.xlane.xlu0 %451 }
 0x161   : > { %v453_v38 = vrot.slane %v452_v37, 4 }
 0x163   : > { %v454_v39 = vadd.f32 %v453_v38, %v452_v37 }
 0x165   : > { %v455_v40 = vrot.slane %v454_v39, 2 }
 0x167   : > { %v456_v41 = vadd.f32 %v455_v40, %v454_v39 }
 0x169   : > { %v457_v42 = vrot.slane %v456_v41, 1 }
 0x16b   : > { %v458_v43 = vadd.f32 %v457_v42, %v456_v41 }
 0x16d   : > { %v459_v44 = vmul.f32 0.0009765625, %v458_v43 }
 0x16f   : > { %461 = vst.msk [vmem:[%s176_s28] sm:$0x1] %vm460_vm9, %v459_v44 }
 0x170 PF: > { %p13_p8 = scmp.ge.s32.totalorder %s792_s14, 4   ;;  %s949_s9 = smov %s742_s10 }
 0x171   : > { %s950_s10 = smov %s746_s11  ;;  %s951_s11 = smov %s802_s17 }
 0x172   : > { %s952_s12 = smov %s792_s14  ;;  %15 = sbr.rel (!%p13_p8) target bundleno = 4 (0x4), region = 80 }
 0x177   :  { %479 = vsyncpa [#allocation3], 1 }
 0x178   :  { %481 = vsyncpa [#allocation3 + $0x1], 1 }
 0x179   :  { %482 = vsyncpa [#allocation5], 1 }
 0x17a   :  { %484 = vsyncpa [#allocation5 + $0x1], 1 }

</bundles_post_ra>
